<compile_context>
chip_gen: v7x
topology: tpu7x:2x2x1
jax: 0.10.0
libtpu: 0.0.40
codegen_flags: <defaults>
</compile_context>

<pallas_src>
import functools
import math

import jax
import jax.numpy as jnp
from jax import lax
from jax.experimental import pallas as pl
from jax.experimental.pallas import tpu as pltpu


# -----------------------------------------------------------------------------
# Kernels
# -----------------------------------------------------------------------------
def _noisy_weight_kernel(w_ref, n_ref, o_ref):
    # One pass over the weight: fold the dropconnect noise in (f32 math) and
    # write the MXU operand dtype (bf16 by default).  Purely mem-bound; runs
    # once per forward so every weight element is noised exactly once.
    o_ref[...] = (w_ref[...] * n_ref[...]).astype(o_ref.dtype)


def _linear_kernel(x_ref, w_ref, *refs, has_bias):
    # Grid is (j, i, k) = (out-feature block, batch block, reduction block).
    if has_bias:
        b_ref, o_ref, acc_ref = refs
    else:
        b_ref = None
        o_ref, acc_ref = refs

    k = pl.program_id(2)
    num_k = pl.num_programs(2)

    @pl.when(k == 0)
    def _():
        acc_ref[...] = jnp.zeros_like(acc_ref)

    # (tm, tk) x (tn, tk) contracting the shared K dim -> (tm, tn).  No
    # transpose of the weight tile is needed before the MXU.
    acc_ref[...] += lax.dot_general(
        x_ref[...], w_ref[...],
        dimension_numbers=(((1,), (1,)), ((), ())),
        preferred_element_type=jnp.float32)

    @pl.when(k == num_k - 1)
    def _():
        acc = acc_ref[...]
        if has_bias:
            acc = acc + b_ref[...].astype(jnp.float32)   # (1, tn) broadcast
        o_ref[...] = acc.astype(o_ref.dtype)


# -----------------------------------------------------------------------------
# Wrappers
# -----------------------------------------------------------------------------
def _round_up(x, m):
    return ((x + m - 1) // m) * m


def _pad2d(a, rows, cols):
    pr, pc = rows - a.shape[0], cols - a.shape[1]
    if pr or pc:
        a = jnp.pad(a, ((0, pr), (0, pc)))
    return a


def _pick_tiles(batch, in_features, out_features):
    # tm covers the whole (padded) batch when feasible so the weight stream is
    # read exactly once; tn/tk sized large (lane-dense, fewer grid steps) while
    # keeping the double-buffered working set far below 40 MiB even in f32.
    tm = min(1024, _round_up(batch, 16))
    tn = min(512, _round_up(out_features, 128))
    tk = min(1024, _round_up(in_features, 128))
    return tm, tn, tk


def make_dropconnect_noise(seed, weight_shape, p=0.5):
    """Single dropconnect noise draw per forward: 1 + sigma * N(0, 1)."""
    # TODO(synk): torch.randn_like's RNG stream is not reproduced; the noise is
    # drawn from JAX's RNG in the wrapper because in-kernel pltpu.prng_* does
    # not lower in this (interpret) sandbox.
    sigma = p / (1.0 - p)
    key = jax.random.PRNGKey(seed)
    return 1.0 + sigma * jax.random.normal(key, weight_shape, dtype=jnp.float32)


def _noisy_weight(weight, noise, *, tn, tk, compute_dtype):
    """(weight * noise) materialized once, padded to (Np, Kp), in compute_dtype."""
    N, K = weight.shape
    Np, Kp = _round_up(N, tn), _round_up(K, tk)
    # NOTE: in production, pad the weight once at init instead of per call; the
    # pad below is a no-op when the shapes are already tile-aligned.
    wp = _pad2d(weight.astype(jnp.float32), Np, Kp)
    np_ = _pad2d(noise.astype(jnp.float32), Np, Kp)
    return pl.pallas_call(
        _noisy_weight_kernel,
        out_shape=jax.ShapeDtypeStruct((Np, Kp), compute_dtype),
        grid=(Np // tn, Kp // tk),
        in_specs=[pl.BlockSpec((tn, tk), lambda j, k: (j, k)),
                  pl.BlockSpec((tn, tk), lambda j, k: (j, k))],
        out_specs=pl.BlockSpec((tn, tk), lambda j, k: (j, k)),
        compiler_params=pltpu.CompilerParams(
            dimension_semantics=("parallel", "parallel")),
    )(wp, np_)


def gdropconnect_linear(x, weight, bias, seed, *, p=0.5,
                        tm=None, tn=None, tk=None,
                        use_bf16=True, out_dtype=None):
    """Forward of gDropconnectLinear: x @ (weight * (1 + sigma*randn)).T + bias.

    x:      (B, K) float32
    weight: (N, K) float32 (PyTorch Linear layout)
    bias:   (N,)   float32 or None
    seed:   int — seeds the Gaussian dropconnect noise (one draw per call)
    """
    B, K = x.shape
    N, K2 = weight.shape
    assert K == K2
    out_dtype = x.dtype if out_dtype is None else out_dtype
    compute_dtype = jnp.bfloat16 if use_bf16 else x.dtype

    dtm, dtn, dtk = _pick_tiles(B, K, N)
    tm = dtm if tm is None else tm
    tn = dtn if tn is None else tn
    tk = dtk if tk is None else tk
    assert tm % 8 == 0 and tn % 128 == 0 and tk % 128 == 0

    Bp, Np, Kp = _round_up(B, tm), _round_up(N, tn), _round_up(K, tk)

    # Dropconnect noise folded into the weight exactly once (removes the
    # per-batch-block noise recompute flagged by the perf review).
    noise = make_dropconnect_noise(seed, (N, K), p=p)
    wn = _noisy_weight(weight, noise, tn=tn, tk=tk,
                       compute_dtype=compute_dtype)          # (Np, Kp)

    xp = _pad2d(x, Bp, Kp).astype(compute_dtype)              # (Bp, Kp)

    has_bias = bias is not None
    args = [xp, wn]
    in_specs = [
        pl.BlockSpec((tm, tk), lambda j, i, k: (i, k)),       # x
        pl.BlockSpec((tn, tk), lambda j, i, k: (j, k)),       # noisy weight
    ]
    if has_bias:
        bp = _pad2d(bias.reshape(1, N).astype(jnp.float32), 1, Np)
        args.append(bp)
        in_specs.append(pl.BlockSpec((1, tn), lambda j, i, k: (0, j)))

    # Actual double-buffered working set: 2*(x + w + bias) + 2*out + acc, with
    # 1.5x headroom, capped at 40 MiB so it always fits v7x's 64 MiB VMEM.
    in_item = jnp.dtype(compute_dtype).itemsize
    need = (2 * (tm * tk + tn * tk) * in_item + 2 * tn * 4
            + 2 * tm * tn * jnp.dtype(out_dtype).itemsize + tm * tn * 4)
    vmem_limit = int(min(40 * 1024 * 1024,
                         max(16 * 1024 * 1024, 3 * need // 2)))

    kernel = functools.partial(_linear_kernel, has_bias=has_bias)

    out = pl.pallas_call(
        kernel,
        out_shape=jax.ShapeDtypeStruct((Bp, Np), out_dtype),
        grid_spec=pltpu.PrefetchScalarGridSpec(
            num_scalar_prefetch=0,
            # j (out-feature) leads so a v7x megacore splits on it and the two
            # TensorCores stream disjoint halves of the weight.
            grid=(Np // tn, Bp // tm, Kp // tk),
            in_specs=in_specs,
            out_specs=pl.BlockSpec((tm, tn), lambda j, i, k: (i, j)),
            scratch_shapes=[pltpu.VMEM((tm, tn), jnp.float32)],
        ),
        compiler_params=pltpu.CompilerParams(
            dimension_semantics=("parallel", "parallel", "arbitrary"),
            vmem_limit_bytes=vmem_limit,
        ),
    )(*args)
    return out[:B, :N]


def init_params(key, in_features, out_features, bias=True, dtype=jnp.float32):
    """Deterministic init matching gDropconnectLinear.reset_parameters."""
    stdv = 1.0 / math.sqrt(in_features)
    k_w, k_b = jax.random.split(key)
    weight = jax.random.uniform(k_w, (out_features, in_features), dtype=dtype,
                                minval=1.0 - stdv, maxval=1.0 + stdv)
    b = (jax.random.uniform(k_b, (out_features,), dtype=dtype,
                            minval=-stdv, maxval=stdv) if bias else None)
    return weight, b


if __name__ == "__main__":
    key = jax.random.PRNGKey(0)
    k_x, k_param = jax.random.split(key)

    batch, in_features, out_features = 16, 320, 200
    seed = 1234
    p = 0.5

    x = jax.random.normal(k_x, (batch, in_features), dtype=jnp.float32)
    weight, bias = init_params(k_param, in_features, out_features, bias=True)
    noise = make_dropconnect_noise(seed, weight.shape, p=p)

    def reference(x_, w_, b_, compute_dtype):
        # Same operand rounding as the kernel path (bf16 cast when enabled),
        # f32 accumulation.
        wn = (w_ * noise).astype(compute_dtype).astype(jnp.float32)
        xc = x_.astype(compute_dtype).astype(jnp.float32)
        ref = jnp.einsum("bk,nk->bn", xc, wn, precision=lax.Precision.HIGHEST)
        if b_ is not None:
            ref = ref + b_[None, :]
        return ref

    # 1) Default (production) path: auto tiles, bf16 operands, f32 accumulation.
    out = jax.block_until_ready(gdropconnect_linear(x, weight, bias, seed, p=p))
    assert out.shape == (batch, out_features)
    ref = reference(x, weight, bias, jnp.bfloat16)
    assert jnp.allclose(out, ref, atol=1e-2, rtol=1e-2), \
        float(jnp.max(jnp.abs(out - ref)))

    # 2) Small explicit tiles in f32: grid (2, 1, 3) exercises K accumulation,
    #    out-feature blocking, padding and the bias epilogue.  Tolerance is
    #    loose because the MXU's default f32 matmul precision may use reduced-
    #    precision passes; the bf16 tests above/below are the tight ones.
    out2 = jax.block_until_ready(
        gdropconnect_linear(x, weight, bias, seed, p=p,
                            tm=16, tn=128, tk=128, use_bf16=False))
    ref2 = reference(x, weight, bias, jnp.float32)
    assert jnp.allclose(out2, ref2, atol=5e-2, rtol=5e-2), \
        float(jnp.max(jnp.abs(out2 - ref2)))

    # 3) No-bias path (default tiles, bf16).
    out3 = jax.block_until_ready(gdropconnect_linear(x, weight, None, seed, p=p))
    ref3 = reference(x, weight, None, jnp.bfloat16)
    assert jnp.allclose(out3, ref3, atol=1e-2, rtol=1e-2), \
        float(jnp.max(jnp.abs(out3 - ref3)))

    print("KERNEL_OK")
</pallas_src>

<mosaic_0001>
module attributes {stable_mosaic.version = 11 : i64} {
  func.func @_noisy_weight_kernel(%arg0: i32, %arg1: i32, %arg2: memref<256x384xf32, #tpu.memory_space<vmem>>, %arg3: memref<256x384xf32, #tpu.memory_space<vmem>>, %arg4: memref<256x384xbf16, #tpu.memory_space<vmem>>) attributes {dimension_semantics = [#tpu.dimension_semantics<parallel>, #tpu.dimension_semantics<parallel>], iteration_bounds = array<i64: 1, 1>, scalar_prefetch = 0 : i64, scratch_operands = 0 : i64, tpu.core_type = #tpu.core_type<tc>, window_params = [{transform_indices = @transform_0, window_bounds = array<i64: 256, 384>}, {transform_indices = @transform_1, window_bounds = array<i64: 256, 384>}, {transform_indices = @transform_2, window_bounds = array<i64: 256, 384>}]} {
    %c0 = arith.constant 0 : index
    %c0_0 = arith.constant 0 : index
    %0 = vector.load %arg2[%c0, %c0_0] : memref<256x384xf32, #tpu.memory_space<vmem>>, vector<256x384xf32>
    %c0_1 = arith.constant 0 : index
    %c0_2 = arith.constant 0 : index
    %1 = vector.load %arg3[%c0_1, %c0_2] : memref<256x384xf32, #tpu.memory_space<vmem>>, vector<256x384xf32>
    %2 = arith.mulf %0, %1 : vector<256x384xf32>
    %3 = arith.truncf %2 : vector<256x384xf32> to vector<256x384xbf16>
    %c0_3 = arith.constant 0 : index
    %c0_4 = arith.constant 0 : index
    %4 = vector.load %arg4[%c0_3, %c0_4] : memref<256x384xbf16, #tpu.memory_space<vmem>>, vector<256x384xbf16>
    tpu.vector_store %arg4[%c0_3, %c0_4], %3 {strides = array<i32>} : memref<256x384xbf16, #tpu.memory_space<vmem>>, vector<256x384xbf16>,
    return
  }
  func.func @transform_0(%arg0: i32, %arg1: i32) -> (i32, i32) {
    %c0_i32 = arith.constant 0 : i32
    return %arg0, %arg1 : i32, i32
  }
  func.func @transform_1(%arg0: i32, %arg1: i32) -> (i32, i32) {
    %c0_i32 = arith.constant 0 : i32
    return %arg0, %arg1 : i32, i32
  }
  func.func @transform_2(%arg0: i32, %arg1: i32) -> (i32, i32) {
    %c0_i32 = arith.constant 0 : i32
    return %arg0, %arg1 : i32, i32
  }
}

</mosaic_0001>

<bundles_post_ra>
// kernel: tpu_custom_call.1
= control target key start
LH: loop header
LB: loop body
LE: loop exit
PB: predicated region body
PF: predicated region fallthrough
CT: control target
= control target key end

     0   :  { %7 = vsyncpa [#allocation3], 0  ;;  %s995_s0 = inlined_call_operand.hbm [shape: f32[256,384], index: 0, kind: input, shape index: {}]   ;;  %s996_s1 = inlined_call_operand.hbm [shape: f32[256,384], index: 1, kind: input, shape index: {}]   ;;  %s997_s2 = inlined_call_operand.hbm [shape: bf16[256,384], index: 2, kind: output, shape index: {}]  }
   0x1   :  { %8 = vsyncpa [#allocation6], 0 }
   0x2   :  { %9 = vsyncpa [#allocation4], 0  ;;  %s937_s9 = smov [#allocation2]   ;;  %s865_s13 = scalar_lea.hbm %s995_s0, 12288 }
   0x3   :  { %s15_s10 = sshll.u32 %s937_s9, 4  ;;  %p866_p0 = scmp.ne.s32.totalorder %s995_s0, %s865_s13  ;;  %s16_s10 = int_to_ptr.vmem [resolvable:$true] %s15_s10 }
   0x4   :  { %p869_p1 = scmp.lt.u32.totalorder %s865_s13, %s995_s0 }
   0x6   :  { %p871_p2 = pnand %p869_p1, %p866_p0 }
   0x8   :  { %874 = shalt.err (!%p871_p2)
}
   0x9   :  { %s875_s18 = scalar_lea.vmem %s16_s10, 12288  ;;  %p880_p4 = scmp.lt.s32.totalorder %s16_s10, %s16_s10 }
   0xa   :  { %p876_p3 = scmp.ne.s32.totalorder %s16_s10, %s875_s18  ;;  %p881_p5 = scmp.lt.s32.totalorder %s875_s18, %s875_s18 }
   0xc   :  { %p882_p6 = por %p881_p5, %p880_p4 }
   0xe   :  { %p883_p7 = pnand %p882_p6, %p876_p3 }
  0x10   :  { %886 = shalt.err (!%p883_p7)
}
  0x11   :  { %s938_s19 = smov 384   ;;  %s939_s20 = smov 24  }
  0x12   :  { %21 = dma.hbm_to_vmem [thread:$0]  %s995_s0, 12288, %s16_s10, [#allocation3], %s938_s19, %s938_s19, %s939_s20  }
  0x13   :  { %s940_s23 = smov [#allocation5]   ;;  %s887_s27 = scalar_lea.hbm %s996_s1, 12288 }
  0x14   :  { %s27_s24 = sshll.u32 %s940_s23, 4  ;;  %p888_p8 = scmp.ne.s32.totalorder %s996_s1, %s887_s27  ;;  %s28_s24 = int_to_ptr.vmem [resolvable:$true] %s27_s24 }
  0x15   :  { %p891_p9 = scmp.lt.u32.totalorder %s887_s27, %s996_s1 }
  0x17   :  { %p893_p10 = pnand %p891_p9, %p888_p8 }
  0x19   :  { %896 = shalt.err (!%p893_p10)
}
  0x1a   :  { %s897_s4 = scalar_lea.vmem %s28_s24, 12288  ;;  %p902_p12 = scmp.lt.s32.totalorder %s28_s24, %s28_s24 }
  0x1b   :  { %p898_p11 = scmp.ne.s32.totalorder %s28_s24, %s897_s4  ;;  %p903_p13 = scmp.lt.s32.totalorder %s897_s4, %s897_s4 }
  0x1d   :  { %p904_p0 = por %p903_p13, %p902_p12 }
  0x1f   :  { %p905_p1 = pnand %p904_p0, %p898_p11 }
  0x21   :  { %908 = shalt.err (!%p905_p1)
}
  0x22   :  { %33 = dma.hbm_to_vmem [thread:$0]  %s996_s1, 12288, %s28_s24, [#allocation6], %s938_s19, %s938_s19, %s939_s20  }
  0x23   :  { %931 = dma.done.wait [#allocation3], 12288  }
  0x24   :  { %932 = vsyncadd [#allocation3], 4294955008 }
  0x25   :  { %933 = dma.done.wait [#allocation6], 12288  }
  0x26   :  { %934 = vsyncadd [#allocation6], 4294955008  ;;  %v40_v0 = vld [vmem:[#allocation2] sm:$0xff]  ;;  %v41_v1 = vld [vmem:[#allocation2 + $0x8] sm:$0xff]  ;;  %s941_s1 = smov [#allocation7]  }
  0x27   :  { %v136_v2 = vld [vmem:[#allocation5] sm:$0xff]  ;;  %v137_v3 = vld [vmem:[#allocation5 + $0x8] sm:$0xff]  ;;  %v42_v5 = vld [vmem:[#allocation2 + $0x10] sm:$0xff]  ;;  %s717_s6 = sshll.u32 %s941_s1, 4  ;;  %s718_s6 = int_to_ptr.vmem [resolvable:$true] %s717_s6 }
  0x28   :  { %v232_v4 = vmul.f32 %v136_v2, %v40_v0  ;;  %v138_v6 = vld [vmem:[#allocation5 + $0x10] sm:$0xff]  ;;  %v233_v7 = vmul.f32 %v137_v3, %v41_v1  ;;  %v43_v9 = vld [vmem:[#allocation2 + $0x18] sm:$0xff]  ;;  %v44_v10 = vld [vmem:[#allocation2 + $0x20] sm:$0xff]  ;;  %s909_s7 = scalar_lea.vmem %s718_s6, 6144  ;;  %p914_p3 = scmp.lt.s32.totalorder %s718_s6, %s718_s6 }
  0x29   :  { %v234_v8 = vmul.f32 %v138_v6, %v42_v5  ;;  %v139_v11 = vld [vmem:[#allocation5 + $0x18] sm:$0xff]  ;;  %v140_v12 = vld [vmem:[#allocation5 + $0x20] sm:$0xff]  ;;  %v45_v14 = vld [vmem:[#allocation2 + $0x28] sm:$0xff]  ;;  %p910_p2 = scmp.ne.s32.totalorder %s718_s6, %s909_s7  ;;  %p915_p4 = scmp.lt.s32.totalorder %s909_s7, %s909_s7 }
  0x2a   :  { %v235_v13 = vmul.f32 %v139_v11, %v43_v9  ;;  %v141_v15 = vld [vmem:[#allocation5 + $0x28] sm:$0xff]  ;;  %v794_v16 = vpack.c.bf16 %v233_v7, %v232_v4  ;;  %v236_v18 = vmul.f32 %v140_v12, %v44_v10  ;;  %v46_v20 = vld [vmem:[#allocation2 + $0x30] sm:$0xff]  ;;  %v47_v21 = vld [vmem:[#allocation2 + $0x38] sm:$0xff] }
  0x2b   :  { %v795_v17 = vpack.c.bf16 %v234_v8, %v234_v8  ;;  %v237_v19 = vmul.f32 %v141_v15, %v45_v14  ;;  %v142_v22 = vld [vmem:[#allocation5 + $0x30] sm:$0xff]  ;;  %v143_v23 = vld [vmem:[#allocation5 + $0x38] sm:$0xff]  ;;  %v48_v25 = vld [vmem:[#allocation2 + $0x40] sm:$0xff]  ;;  %p916_p5 = por %p915_p4, %p914_p3 }
  0x2c   :  { %v238_v24 = vmul.f32 %v142_v22, %v46_v20  ;;  %v144_v26 = vld [vmem:[#allocation5 + $0x40] sm:$0xff]  ;;  %648 = vst [vmem:[#allocation7] sm:$0xff] %v794_v16  ;;  %v796_v27 = vpack.c.bf16 %v236_v18, %v235_v13  ;;  %v239_v29 = vmul.f32 %v143_v23, %v47_v21  ;;  %v49_v31 = vld [vmem:[#allocation2 + $0x48] sm:$0xff]  ;;  %v50_v32 = vld [vmem:[#allocation2 + $0x50] sm:$0xff] }
  0x2d   :  { %649 = vst [vmem:[#allocation7 + $0x8] sm:$0xf] %v795_v17  ;;  %v797_v28 = vpack.c.bf16 %v237_v19, %v237_v19  ;;  %v240_v30 = vmul.f32 %v144_v26, %v48_v25  ;;  %v145_v33 = vld [vmem:[#allocation5 + $0x48] sm:$0xff]  ;;  %v146_v34 = vld [vmem:[#allocation5 + $0x50] sm:$0xff]  ;;  %v51_v36 = vld [vmem:[#allocation2 + $0x58] sm:$0xff]  ;;  %p917_p6 = pnand %p916_p5, %p910_p2 }
  0x2e   :  { %v241_v35 = vmul.f32 %v145_v33, %v49_v31  ;;  %v147_v37 = vld [vmem:[#allocation5 + $0x58] sm:$0xff]  ;;  %650 = vst [vmem:[#allocation7 + $0xc] sm:$0xff] %v796_v27  ;;  %v798_v38 = vpack.c.bf16 %v239_v29, %v238_v24  ;;  %v242_v40 = vmul.f32 %v146_v34, %v50_v32  ;;  %v52_v42 = vld [vmem:[#allocation2 + $0x60] sm:$0xff]  ;;  %v53_v43 = vld [vmem:[#allocation2 + $0x68] sm:$0xff] }
  0x2f   :  { %651 = vst [vmem:[#allocation7 + $0x14] sm:$0xf] %v797_v28  ;;  %v799_v39 = vpack.c.bf16 %v240_v30, %v240_v30  ;;  %v243_v41 = vmul.f32 %v147_v37, %v51_v36  ;;  %v148_v44 = vld [vmem:[#allocation5 + $0x60] sm:$0xff]  ;;  %v149_v45 = vld [vmem:[#allocation5 + $0x68] sm:$0xff]  ;;  %v54_v47 = vld [vmem:[#allocation2 + $0x70] sm:$0xff] }
  0x30   :  { %v244_v46 = vmul.f32 %v148_v44, %v52_v42  ;;  %v150_v48 = vld [vmem:[#allocation5 + $0x70] sm:$0xff]  ;;  %652 = vst [vmem:[#allocation7 + $0x18] sm:$0xff] %v798_v38  ;;  %v800_v49 = vpack.c.bf16 %v242_v40, %v241_v35  ;;  %v245_v51 = vmul.f32 %v149_v45, %v53_v43  ;;  %v55_v53 = vld [vmem:[#allocation2 + $0x78] sm:$0xff]  ;;  %v56_v54 = vld [vmem:[#allocation2 + $0x80] sm:$0xff] }
  0x31   :  { %653 = vst [vmem:[#allocation7 + $0x20] sm:$0xf] %v799_v39  ;;  %v801_v50 = vpack.c.bf16 %v243_v41, %v243_v41  ;;  %v246_v52 = vmul.f32 %v150_v48, %v54_v47  ;;  %v151_v55 = vld [vmem:[#allocation5 + $0x78] sm:$0xff]  ;;  %v152_v56 = vld [vmem:[#allocation5 + $0x80] sm:$0xff]  ;;  %v57_v58 = vld [vmem:[#allocation2 + $0x88] sm:$0xff] }
  0x32   :  { %v247_v57 = vmul.f32 %v151_v55, %v55_v53  ;;  %v153_v59 = vld [vmem:[#allocation5 + $0x88] sm:$0xff]  ;;  %654 = vst [vmem:[#allocation7 + $0x24] sm:$0xff] %v800_v49  ;;  %v802_v60 = vpack.c.bf16 %v245_v51, %v244_v46  ;;  %v248_v62 = vmul.f32 %v152_v56, %v56_v54  ;;  %v58_v0 = vld [vmem:[#allocation2 + $0x90] sm:$0xff]  ;;  %v59_v1 = vld [vmem:[#allocation2 + $0x98] sm:$0xff] }
  0x33   :  { %655 = vst [vmem:[#allocation7 + $0x2c] sm:$0xf] %v801_v50  ;;  %v803_v61 = vpack.c.bf16 %v246_v52, %v246_v52  ;;  %v249_v63 = vmul.f32 %v153_v59, %v57_v58  ;;  %v154_v2 = vld [vmem:[#allocation5 + $0x90] sm:$0xff]  ;;  %v155_v3 = vld [vmem:[#allocation5 + $0x98] sm:$0xff]  ;;  %v60_v5 = vld [vmem:[#allocation2 + $0xa0] sm:$0xff] }
  0x34   :  { %v250_v4 = vmul.f32 %v154_v2, %v58_v0  ;;  %v156_v6 = vld [vmem:[#allocation5 + $0xa0] sm:$0xff]  ;;  %656 = vst [vmem:[#allocation7 + $0x30] sm:$0xff] %v802_v60  ;;  %v804_v7 = vpack.c.bf16 %v248_v62, %v247_v57  ;;  %v251_v9 = vmul.f32 %v155_v3, %v59_v1  ;;  %v61_v11 = vld [vmem:[#allocation2 + $0xa8] sm:$0xff]  ;;  %v62_v12 = vld [vmem:[#allocation2 + $0xb0] sm:$0xff] }
  0x35   :  { %657 = vst [vmem:[#allocation7 + $0x38] sm:$0xf] %v803_v61  ;;  %v805_v8 = vpack.c.bf16 %v249_v63, %v249_v63  ;;  %v252_v10 = vmul.f32 %v156_v6, %v60_v5  ;;  %v157_v13 = vld [vmem:[#allocation5 + $0xa8] sm:$0xff]  ;;  %v158_v14 = vld [vmem:[#allocation5 + $0xb0] sm:$0xff]  ;;  %v63_v16 = vld [vmem:[#allocation2 + $0xb8] sm:$0xff] }
  0x36   :  { %v253_v15 = vmul.f32 %v157_v13, %v61_v11  ;;  %v159_v17 = vld [vmem:[#allocation5 + $0xb8] sm:$0xff]  ;;  %658 = vst [vmem:[#allocation7 + $0x3c] sm:$0xff] %v804_v7  ;;  %v806_v18 = vpack.c.bf16 %v251_v9, %v250_v4  ;;  %v254_v20 = vmul.f32 %v158_v14, %v62_v12  ;;  %v64_v22 = vld [vmem:[#allocation2 + $0xc0] sm:$0xff]  ;;  %v65_v23 = vld [vmem:[#allocation2 + $0xc8] sm:$0xff] }
  0x37   :  { %659 = vst [vmem:[#allocation7 + $0x44] sm:$0xf] %v805_v8  ;;  %v807_v19 = vpack.c.bf16 %v252_v10, %v252_v10  ;;  %v255_v21 = vmul.f32 %v159_v17, %v63_v16  ;;  %v160_v24 = vld [vmem:[#allocation5 + $0xc0] sm:$0xff]  ;;  %v161_v25 = vld [vmem:[#allocation5 + $0xc8] sm:$0xff]  ;;  %v66_v27 = vld [vmem:[#allocation2 + $0xd0] sm:$0xff] }
  0x38   :  { %v256_v26 = vmul.f32 %v160_v24, %v64_v22  ;;  %v162_v28 = vld [vmem:[#allocation5 + $0xd0] sm:$0xff]  ;;  %660 = vst [vmem:[#allocation7 + $0x48] sm:$0xff] %v806_v18  ;;  %v808_v29 = vpack.c.bf16 %v254_v20, %v253_v15  ;;  %v257_v31 = vmul.f32 %v161_v25, %v65_v23  ;;  %v67_v33 = vld [vmem:[#allocation2 + $0xd8] sm:$0xff]  ;;  %v68_v34 = vld [vmem:[#allocation2 + $0xe0] sm:$0xff] }
  0x39   :  { %661 = vst [vmem:[#allocation7 + $0x50] sm:$0xf] %v807_v19  ;;  %v809_v30 = vpack.c.bf16 %v255_v21, %v255_v21  ;;  %v258_v32 = vmul.f32 %v162_v28, %v66_v27  ;;  %v163_v35 = vld [vmem:[#allocation5 + $0xd8] sm:$0xff]  ;;  %v164_v36 = vld [vmem:[#allocation5 + $0xe0] sm:$0xff]  ;;  %v69_v38 = vld [vmem:[#allocation2 + $0xe8] sm:$0xff] }
  0x3a   :  { %v259_v37 = vmul.f32 %v163_v35, %v67_v33  ;;  %v165_v39 = vld [vmem:[#allocation5 + $0xe8] sm:$0xff]  ;;  %662 = vst [vmem:[#allocation7 + $0x54] sm:$0xff] %v808_v29  ;;  %v810_v40 = vpack.c.bf16 %v257_v31, %v256_v26  ;;  %v260_v42 = vmul.f32 %v164_v36, %v68_v34  ;;  %v70_v44 = vld [vmem:[#allocation2 + $0xf0] sm:$0xff]  ;;  %v71_v45 = vld [vmem:[#allocation2 + $0xf8] sm:$0xff] }
  0x3b   :  { %663 = vst [vmem:[#allocation7 + $0x5c] sm:$0xf] %v809_v30  ;;  %v811_v41 = vpack.c.bf16 %v258_v32, %v258_v32  ;;  %v261_v43 = vmul.f32 %v165_v39, %v69_v38  ;;  %v166_v46 = vld [vmem:[#allocation5 + $0xf0] sm:$0xff]  ;;  %v167_v47 = vld [vmem:[#allocation5 + $0xf8] sm:$0xff]  ;;  %v72_v49 = vld [vmem:[#allocation2 + $0x100] sm:$0xff] }
  0x3c   :  { %v262_v48 = vmul.f32 %v166_v46, %v70_v44  ;;  %v168_v50 = vld [vmem:[#allocation5 + $0x100] sm:$0xff]  ;;  %664 = vst [vmem:[#allocation7 + $0x60] sm:$0xff] %v810_v40  ;;  %v812_v51 = vpack.c.bf16 %v260_v42, %v259_v37  ;;  %v263_v53 = vmul.f32 %v167_v47, %v71_v45  ;;  %v73_v55 = vld [vmem:[#allocation2 + $0x108] sm:$0xff]  ;;  %v74_v56 = vld [vmem:[#allocation2 + $0x110] sm:$0xff] }
  0x3d   :  { %665 = vst [vmem:[#allocation7 + $0x68] sm:$0xf] %v811_v41  ;;  %v813_v52 = vpack.c.bf16 %v261_v43, %v261_v43  ;;  %v264_v54 = vmul.f32 %v168_v50, %v72_v49  ;;  %v169_v57 = vld [vmem:[#allocation5 + $0x108] sm:$0xff]  ;;  %v170_v58 = vld [vmem:[#allocation5 + $0x110] sm:$0xff]  ;;  %v75_v60 = vld [vmem:[#allocation2 + $0x118] sm:$0xff] }
  0x3e   :  { %v265_v59 = vmul.f32 %v169_v57, %v73_v55  ;;  %v171_v61 = vld [vmem:[#allocation5 + $0x118] sm:$0xff]  ;;  %666 = vst [vmem:[#allocation7 + $0x6c] sm:$0xff] %v812_v51  ;;  %v814_v62 = vpack.c.bf16 %v263_v53, %v262_v48  ;;  %v266_v0 = vmul.f32 %v170_v58, %v74_v56  ;;  %v76_v2 = vld [vmem:[#allocation2 + $0x120] sm:$0xff]  ;;  %v77_v3 = vld [vmem:[#allocation2 + $0x128] sm:$0xff] }
  0x3f   :  { %667 = vst [vmem:[#allocation7 + $0x74] sm:$0xf] %v813_v52  ;;  %v815_v63 = vpack.c.bf16 %v264_v54, %v264_v54  ;;  %v267_v1 = vmul.f32 %v171_v61, %v75_v60  ;;  %v172_v4 = vld [vmem:[#allocation5 + $0x120] sm:$0xff]  ;;  %v173_v5 = vld [vmem:[#allocation5 + $0x128] sm:$0xff]  ;;  %v78_v7 = vld [vmem:[#allocation2 + $0x130] sm:$0xff] }
  0x40   :  { %v268_v6 = vmul.f32 %v172_v4, %v76_v2  ;;  %v174_v8 = vld [vmem:[#allocation5 + $0x130] sm:$0xff]  ;;  %668 = vst [vmem:[#allocation7 + $0x78] sm:$0xff] %v814_v62  ;;  %v816_v9 = vpack.c.bf16 %v266_v0, %v265_v59  ;;  %v269_v11 = vmul.f32 %v173_v5, %v77_v3  ;;  %v79_v13 = vld [vmem:[#allocation2 + $0x138] sm:$0xff]  ;;  %v80_v14 = vld [vmem:[#allocation2 + $0x140] sm:$0xff] }
  0x41   :  { %669 = vst [vmem:[#allocation7 + $0x80] sm:$0xf] %v815_v63  ;;  %v817_v10 = vpack.c.bf16 %v267_v1, %v267_v1  ;;  %v270_v12 = vmul.f32 %v174_v8, %v78_v7  ;;  %v175_v15 = vld [vmem:[#allocation5 + $0x138] sm:$0xff]  ;;  %v176_v16 = vld [vmem:[#allocation5 + $0x140] sm:$0xff]  ;;  %v81_v18 = vld [vmem:[#allocation2 + $0x148] sm:$0xff] }
  0x42   :  { %v271_v17 = vmul.f32 %v175_v15, %v79_v13  ;;  %v177_v19 = vld [vmem:[#allocation5 + $0x148] sm:$0xff]  ;;  %670 = vst [vmem:[#allocation7 + $0x84] sm:$0xff] %v816_v9  ;;  %v818_v20 = vpack.c.bf16 %v269_v11, %v268_v6  ;;  %v272_v22 = vmul.f32 %v176_v16, %v80_v14  ;;  %v82_v24 = vld [vmem:[#allocation2 + $0x150] sm:$0xff]  ;;  %v83_v25 = vld [vmem:[#allocation2 + $0x158] sm:$0xff] }
  0x43   :  { %671 = vst [vmem:[#allocation7 + $0x8c] sm:$0xf] %v817_v10  ;;  %v819_v21 = vpack.c.bf16 %v270_v12, %v270_v12  ;;  %v273_v23 = vmul.f32 %v177_v19, %v81_v18  ;;  %v178_v26 = vld [vmem:[#allocation5 + $0x150] sm:$0xff]  ;;  %v179_v27 = vld [vmem:[#allocation5 + $0x158] sm:$0xff]  ;;  %v84_v29 = vld [vmem:[#allocation2 + $0x160] sm:$0xff] }
  0x44   :  { %v274_v28 = vmul.f32 %v178_v26, %v82_v24  ;;  %v180_v30 = vld [vmem:[#allocation5 + $0x160] sm:$0xff]  ;;  %672 = vst [vmem:[#allocation7 + $0x90] sm:$0xff] %v818_v20  ;;  %v820_v31 = vpack.c.bf16 %v272_v22, %v271_v17  ;;  %v275_v33 = vmul.f32 %v179_v27, %v83_v25  ;;  %v85_v35 = vld [vmem:[#allocation2 + $0x168] sm:$0xff]  ;;  %v86_v36 = vld [vmem:[#allocation2 + $0x170] sm:$0xff] }
  0x45   :  { %673 = vst [vmem:[#allocation7 + $0x98] sm:$0xf] %v819_v21  ;;  %v821_v32 = vpack.c.bf16 %v273_v23, %v273_v23  ;;  %v276_v34 = vmul.f32 %v180_v30, %v84_v29  ;;  %v181_v37 = vld [vmem:[#allocation5 + $0x168] sm:$0xff]  ;;  %v182_v38 = vld [vmem:[#allocation5 + $0x170] sm:$0xff]  ;;  %v87_v40 = vld [vmem:[#allocation2 + $0x178] sm:$0xff] }
  0x46   :  { %v277_v39 = vmul.f32 %v181_v37, %v85_v35  ;;  %v183_v41 = vld [vmem:[#allocation5 + $0x178] sm:$0xff]  ;;  %674 = vst [vmem:[#allocation7 + $0x9c] sm:$0xff] %v820_v31  ;;  %v822_v42 = vpack.c.bf16 %v275_v33, %v274_v28  ;;  %v278_v44 = vmul.f32 %v182_v38, %v86_v36  ;;  %v88_v46 = vld [vmem:[#allocation2 + $0x180] sm:$0xff]  ;;  %v89_v47 = vld [vmem:[#allocation2 + $0x188] sm:$0xff] }
  0x47   :  { %675 = vst [vmem:[#allocation7 + $0xa4] sm:$0xf] %v821_v32  ;;  %v823_v43 = vpack.c.bf16 %v276_v34, %v276_v34  ;;  %v279_v45 = vmul.f32 %v183_v41, %v87_v40  ;;  %v184_v48 = vld [vmem:[#allocation5 + $0x180] sm:$0xff]  ;;  %v185_v49 = vld [vmem:[#allocation5 + $0x188] sm:$0xff]  ;;  %v90_v51 = vld [vmem:[#allocation2 + $0x190] sm:$0xff] }
  0x48   :  { %v280_v50 = vmul.f32 %v184_v48, %v88_v46  ;;  %v186_v52 = vld [vmem:[#allocation5 + $0x190] sm:$0xff]  ;;  %676 = vst [vmem:[#allocation7 + $0xa8] sm:$0xff] %v822_v42  ;;  %v824_v53 = vpack.c.bf16 %v278_v44, %v277_v39  ;;  %v281_v55 = vmul.f32 %v185_v49, %v89_v47  ;;  %v91_v57 = vld [vmem:[#allocation2 + $0x198] sm:$0xff]  ;;  %v92_v58 = vld [vmem:[#allocation2 + $0x1a0] sm:$0xff] }
  0x49   :  { %677 = vst [vmem:[#allocation7 + $0xb0] sm:$0xf] %v823_v43  ;;  %v825_v54 = vpack.c.bf16 %v279_v45, %v279_v45  ;;  %v282_v56 = vmul.f32 %v186_v52, %v90_v51  ;;  %v187_v59 = vld [vmem:[#allocation5 + $0x198] sm:$0xff]  ;;  %v188_v60 = vld [vmem:[#allocation5 + $0x1a0] sm:$0xff]  ;;  %v93_v62 = vld [vmem:[#allocation2 + $0x1a8] sm:$0xff] }
  0x4a   :  { %v283_v61 = vmul.f32 %v187_v59, %v91_v57  ;;  %v189_v63 = vld [vmem:[#allocation5 + $0x1a8] sm:$0xff]  ;;  %678 = vst [vmem:[#allocation7 + $0xb4] sm:$0xff] %v824_v53  ;;  %v826_v0 = vpack.c.bf16 %v281_v55, %v280_v50  ;;  %v284_v2 = vmul.f32 %v188_v60, %v92_v58  ;;  %v94_v4 = vld [vmem:[#allocation2 + $0x1b0] sm:$0xff]  ;;  %v95_v5 = vld [vmem:[#allocation2 + $0x1b8] sm:$0xff] }
  0x4b   :  { %679 = vst [vmem:[#allocation7 + $0xbc] sm:$0xf] %v825_v54  ;;  %v827_v1 = vpack.c.bf16 %v282_v56, %v282_v56  ;;  %v285_v3 = vmul.f32 %v189_v63, %v93_v62  ;;  %v190_v6 = vld [vmem:[#allocation5 + $0x1b0] sm:$0xff]  ;;  %v191_v7 = vld [vmem:[#allocation5 + $0x1b8] sm:$0xff]  ;;  %v96_v9 = vld [vmem:[#allocation2 + $0x1c0] sm:$0xff] }
  0x4c   :  { %v286_v8 = vmul.f32 %v190_v6, %v94_v4  ;;  %v192_v10 = vld [vmem:[#allocation5 + $0x1c0] sm:$0xff]  ;;  %680 = vst [vmem:[#allocation7 + $0xc0] sm:$0xff] %v826_v0  ;;  %v828_v11 = vpack.c.bf16 %v284_v2, %v283_v61  ;;  %v287_v13 = vmul.f32 %v191_v7, %v95_v5  ;;  %v97_v15 = vld [vmem:[#allocation2 + $0x1c8] sm:$0xff]  ;;  %v98_v16 = vld [vmem:[#allocation2 + $0x1d0] sm:$0xff] }
  0x4d   :  { %681 = vst [vmem:[#allocation7 + $0xc8] sm:$0xf] %v827_v1  ;;  %v829_v12 = vpack.c.bf16 %v285_v3, %v285_v3  ;;  %v288_v14 = vmul.f32 %v192_v10, %v96_v9  ;;  %v193_v17 = vld [vmem:[#allocation5 + $0x1c8] sm:$0xff]  ;;  %v194_v18 = vld [vmem:[#allocation5 + $0x1d0] sm:$0xff]  ;;  %v99_v20 = vld [vmem:[#allocation2 + $0x1d8] sm:$0xff] }
  0x4e   :  { %v289_v19 = vmul.f32 %v193_v17, %v97_v15  ;;  %v195_v21 = vld [vmem:[#allocation5 + $0x1d8] sm:$0xff]  ;;  %682 = vst [vmem:[#allocation7 + $0xcc] sm:$0xff] %v828_v11  ;;  %v830_v22 = vpack.c.bf16 %v287_v13, %v286_v8  ;;  %v290_v24 = vmul.f32 %v194_v18, %v98_v16  ;;  %v100_v26 = vld [vmem:[#allocation2 + $0x1e0] sm:$0xff]  ;;  %v101_v27 = vld [vmem:[#allocation2 + $0x1e8] sm:$0xff] }
  0x4f   :  { %683 = vst [vmem:[#allocation7 + $0xd4] sm:$0xf] %v829_v12  ;;  %v831_v23 = vpack.c.bf16 %v288_v14, %v288_v14  ;;  %v291_v25 = vmul.f32 %v195_v21, %v99_v20  ;;  %v196_v28 = vld [vmem:[#allocation5 + $0x1e0] sm:$0xff]  ;;  %v197_v29 = vld [vmem:[#allocation5 + $0x1e8] sm:$0xff]  ;;  %v102_v31 = vld [vmem:[#allocation2 + $0x1f0] sm:$0xff] }
  0x50   :  { %v292_v30 = vmul.f32 %v196_v28, %v100_v26  ;;  %v198_v32 = vld [vmem:[#allocation5 + $0x1f0] sm:$0xff]  ;;  %684 = vst [vmem:[#allocation7 + $0xd8] sm:$0xff] %v830_v22  ;;  %v832_v33 = vpack.c.bf16 %v290_v24, %v289_v19  ;;  %v293_v35 = vmul.f32 %v197_v29, %v101_v27  ;;  %v103_v37 = vld [vmem:[#allocation2 + $0x1f8] sm:$0xff]  ;;  %v104_v38 = vld [vmem:[#allocation2 + $0x200] sm:$0xff] }
  0x51   :  { %685 = vst [vmem:[#allocation7 + $0xe0] sm:$0xf] %v831_v23  ;;  %v833_v34 = vpack.c.bf16 %v291_v25, %v291_v25  ;;  %v294_v36 = vmul.f32 %v198_v32, %v102_v31  ;;  %v199_v39 = vld [vmem:[#allocation5 + $0x1f8] sm:$0xff]  ;;  %v200_v40 = vld [vmem:[#allocation5 + $0x200] sm:$0xff]  ;;  %v105_v42 = vld [vmem:[#allocation2 + $0x208] sm:$0xff] }
  0x52   :  { %v295_v41 = vmul.f32 %v199_v39, %v103_v37  ;;  %v201_v43 = vld [vmem:[#allocation5 + $0x208] sm:$0xff]  ;;  %686 = vst [vmem:[#allocation7 + $0xe4] sm:$0xff] %v832_v33  ;;  %v834_v44 = vpack.c.bf16 %v293_v35, %v292_v30  ;;  %v296_v46 = vmul.f32 %v200_v40, %v104_v38  ;;  %v106_v48 = vld [vmem:[#allocation2 + $0x210] sm:$0xff]  ;;  %v107_v49 = vld [vmem:[#allocation2 + $0x218] sm:$0xff] }
  0x53   :  { %687 = vst [vmem:[#allocation7 + $0xec] sm:$0xf] %v833_v34  ;;  %v835_v45 = vpack.c.bf16 %v294_v36, %v294_v36  ;;  %v297_v47 = vmul.f32 %v201_v43, %v105_v42  ;;  %v202_v50 = vld [vmem:[#allocation5 + $0x210] sm:$0xff]  ;;  %v203_v51 = vld [vmem:[#allocation5 + $0x218] sm:$0xff]  ;;  %v108_v53 = vld [vmem:[#allocation2 + $0x220] sm:$0xff] }
  0x54   :  { %v298_v52 = vmul.f32 %v202_v50, %v106_v48  ;;  %v204_v54 = vld [vmem:[#allocation5 + $0x220] sm:$0xff]  ;;  %688 = vst [vmem:[#allocation7 + $0xf0] sm:$0xff] %v834_v44  ;;  %v836_v55 = vpack.c.bf16 %v296_v46, %v295_v41  ;;  %v299_v57 = vmul.f32 %v203_v51, %v107_v49  ;;  %v109_v59 = vld [vmem:[#allocation2 + $0x228] sm:$0xff]  ;;  %v110_v60 = vld [vmem:[#allocation2 + $0x230] sm:$0xff] }
  0x55   :  { %689 = vst [vmem:[#allocation7 + $0xf8] sm:$0xf] %v835_v45  ;;  %v837_v56 = vpack.c.bf16 %v297_v47, %v297_v47  ;;  %v300_v58 = vmul.f32 %v204_v54, %v108_v53  ;;  %v205_v61 = vld [vmem:[#allocation5 + $0x228] sm:$0xff]  ;;  %v206_v62 = vld [vmem:[#allocation5 + $0x230] sm:$0xff]  ;;  %v111_v0 = vld [vmem:[#allocation2 + $0x238] sm:$0xff] }
  0x56   :  { %v301_v63 = vmul.f32 %v205_v61, %v109_v59  ;;  %v207_v1 = vld [vmem:[#allocation5 + $0x238] sm:$0xff]  ;;  %690 = vst [vmem:[#allocation7 + $0xfc] sm:$0xff] %v836_v55  ;;  %v838_v2 = vpack.c.bf16 %v299_v57, %v298_v52  ;;  %v302_v4 = vmul.f32 %v206_v62, %v110_v60  ;;  %v112_v6 = vld [vmem:[#allocation2 + $0x240] sm:$0xff]  ;;  %v113_v7 = vld [vmem:[#allocation2 + $0x248] sm:$0xff] }
  0x57   :  { %691 = vst [vmem:[#allocation7 + $0x104] sm:$0xf] %v837_v56  ;;  %v839_v3 = vpack.c.bf16 %v300_v58, %v300_v58  ;;  %v303_v5 = vmul.f32 %v207_v1, %v111_v0  ;;  %v208_v8 = vld [vmem:[#allocation5 + $0x240] sm:$0xff]  ;;  %v209_v9 = vld [vmem:[#allocation5 + $0x248] sm:$0xff]  ;;  %v114_v11 = vld [vmem:[#allocation2 + $0x250] sm:$0xff] }
  0x58   :  { %v304_v10 = vmul.f32 %v208_v8, %v112_v6  ;;  %v210_v12 = vld [vmem:[#allocation5 + $0x250] sm:$0xff]  ;;  %692 = vst [vmem:[#allocation7 + $0x108] sm:$0xff] %v838_v2  ;;  %v840_v13 = vpack.c.bf16 %v302_v4, %v301_v63  ;;  %v305_v15 = vmul.f32 %v209_v9, %v113_v7  ;;  %v115_v17 = vld [vmem:[#allocation2 + $0x258] sm:$0xff]  ;;  %v116_v18 = vld [vmem:[#allocation2 + $0x260] sm:$0xff] }
  0x59   :  { %693 = vst [vmem:[#allocation7 + $0x110] sm:$0xf] %v839_v3  ;;  %v841_v14 = vpack.c.bf16 %v303_v5, %v303_v5  ;;  %v306_v16 = vmul.f32 %v210_v12, %v114_v11  ;;  %v211_v19 = vld [vmem:[#allocation5 + $0x258] sm:$0xff]  ;;  %v212_v20 = vld [vmem:[#allocation5 + $0x260] sm:$0xff]  ;;  %v117_v22 = vld [vmem:[#allocation2 + $0x268] sm:$0xff] }
  0x5a   :  { %v307_v21 = vmul.f32 %v211_v19, %v115_v17  ;;  %v213_v23 = vld [vmem:[#allocation5 + $0x268] sm:$0xff]  ;;  %694 = vst [vmem:[#allocation7 + $0x114] sm:$0xff] %v840_v13  ;;  %v842_v24 = vpack.c.bf16 %v305_v15, %v304_v10  ;;  %v308_v26 = vmul.f32 %v212_v20, %v116_v18  ;;  %v118_v28 = vld [vmem:[#allocation2 + $0x270] sm:$0xff]  ;;  %v119_v29 = vld [vmem:[#allocation2 + $0x278] sm:$0xff] }
  0x5b   :  { %695 = vst [vmem:[#allocation7 + $0x11c] sm:$0xf] %v841_v14  ;;  %v843_v25 = vpack.c.bf16 %v306_v16, %v306_v16  ;;  %v309_v27 = vmul.f32 %v213_v23, %v117_v22  ;;  %v214_v30 = vld [vmem:[#allocation5 + $0x270] sm:$0xff]  ;;  %v215_v31 = vld [vmem:[#allocation5 + $0x278] sm:$0xff]  ;;  %v120_v33 = vld [vmem:[#allocation2 + $0x280] sm:$0xff] }
  0x5c   :  { %v310_v32 = vmul.f32 %v214_v30, %v118_v28  ;;  %v216_v34 = vld [vmem:[#allocation5 + $0x280] sm:$0xff]  ;;  %696 = vst [vmem:[#allocation7 + $0x120] sm:$0xff] %v842_v24  ;;  %v844_v35 = vpack.c.bf16 %v308_v26, %v307_v21  ;;  %v311_v37 = vmul.f32 %v215_v31, %v119_v29  ;;  %v121_v39 = vld [vmem:[#allocation2 + $0x288] sm:$0xff]  ;;  %v122_v40 = vld [vmem:[#allocation2 + $0x290] sm:$0xff] }
  0x5d   :  { %697 = vst [vmem:[#allocation7 + $0x128] sm:$0xf] %v843_v25  ;;  %v845_v36 = vpack.c.bf16 %v309_v27, %v309_v27  ;;  %v312_v38 = vmul.f32 %v216_v34, %v120_v33  ;;  %v217_v41 = vld [vmem:[#allocation5 + $0x288] sm:$0xff]  ;;  %v218_v42 = vld [vmem:[#allocation5 + $0x290] sm:$0xff]  ;;  %v123_v44 = vld [vmem:[#allocation2 + $0x298] sm:$0xff] }
  0x5e   :  { %v313_v43 = vmul.f32 %v217_v41, %v121_v39  ;;  %v219_v45 = vld [vmem:[#allocation5 + $0x298] sm:$0xff]  ;;  %698 = vst [vmem:[#allocation7 + $0x12c] sm:$0xff] %v844_v35  ;;  %v846_v46 = vpack.c.bf16 %v311_v37, %v310_v32  ;;  %v314_v48 = vmul.f32 %v218_v42, %v122_v40  ;;  %v124_v50 = vld [vmem:[#allocation2 + $0x2a0] sm:$0xff]  ;;  %v125_v51 = vld [vmem:[#allocation2 + $0x2a8] sm:$0xff] }
  0x5f   :  { %699 = vst [vmem:[#allocation7 + $0x134] sm:$0xf] %v845_v36  ;;  %v847_v47 = vpack.c.bf16 %v312_v38, %v312_v38  ;;  %v315_v49 = vmul.f32 %v219_v45, %v123_v44  ;;  %v220_v52 = vld [vmem:[#allocation5 + $0x2a0] sm:$0xff]  ;;  %v221_v53 = vld [vmem:[#allocation5 + $0x2a8] sm:$0xff]  ;;  %v126_v55 = vld [vmem:[#allocation2 + $0x2b0] sm:$0xff] }
  0x60   :  { %v316_v54 = vmul.f32 %v220_v52, %v124_v50  ;;  %v222_v56 = vld [vmem:[#allocation5 + $0x2b0] sm:$0xff]  ;;  %700 = vst [vmem:[#allocation7 + $0x138] sm:$0xff] %v846_v46  ;;  %v848_v57 = vpack.c.bf16 %v314_v48, %v313_v43  ;;  %v317_v59 = vmul.f32 %v221_v53, %v125_v51  ;;  %v127_v61 = vld [vmem:[#allocation2 + $0x2b8] sm:$0xff]  ;;  %v128_v62 = vld [vmem:[#allocation2 + $0x2c0] sm:$0xff] }
  0x61   :  { %701 = vst [vmem:[#allocation7 + $0x140] sm:$0xf] %v847_v47  ;;  %v849_v58 = vpack.c.bf16 %v315_v49, %v315_v49  ;;  %v318_v60 = vmul.f32 %v222_v56, %v126_v55  ;;  %v223_v63 = vld [vmem:[#allocation5 + $0x2b8] sm:$0xff]  ;;  %v224_v0 = vld [vmem:[#allocation5 + $0x2c0] sm:$0xff]  ;;  %v129_v2 = vld [vmem:[#allocation2 + $0x2c8] sm:$0xff] }
  0x62   :  { %v319_v1 = vmul.f32 %v223_v63, %v127_v61  ;;  %v225_v3 = vld [vmem:[#allocation5 + $0x2c8] sm:$0xff]  ;;  %702 = vst [vmem:[#allocation7 + $0x144] sm:$0xff] %v848_v57  ;;  %v850_v4 = vpack.c.bf16 %v317_v59, %v316_v54  ;;  %v320_v6 = vmul.f32 %v224_v0, %v128_v62  ;;  %v130_v8 = vld [vmem:[#allocation2 + $0x2d0] sm:$0xff]  ;;  %v131_v9 = vld [vmem:[#allocation2 + $0x2d8] sm:$0xff] }
  0x63   :  { %703 = vst [vmem:[#allocation7 + $0x14c] sm:$0xf] %v849_v58  ;;  %v851_v5 = vpack.c.bf16 %v318_v60, %v318_v60  ;;  %v321_v7 = vmul.f32 %v225_v3, %v129_v2  ;;  %v226_v10 = vld [vmem:[#allocation5 + $0x2d0] sm:$0xff]  ;;  %v227_v11 = vld [vmem:[#allocation5 + $0x2d8] sm:$0xff]  ;;  %v132_v13 = vld [vmem:[#allocation2 + $0x2e0] sm:$0xff] }
  0x64   :  { %v322_v12 = vmul.f32 %v226_v10, %v130_v8  ;;  %v228_v14 = vld [vmem:[#allocation5 + $0x2e0] sm:$0xff]  ;;  %704 = vst [vmem:[#allocation7 + $0x150] sm:$0xff] %v850_v4  ;;  %v852_v15 = vpack.c.bf16 %v320_v6, %v319_v1  ;;  %v323_v17 = vmul.f32 %v227_v11, %v131_v9  ;;  %v133_v19 = vld [vmem:[#allocation2 + $0x2e8] sm:$0xff]  ;;  %v134_v20 = vld [vmem:[#allocation2 + $0x2f0] sm:$0xff] }
  0x65   :  { %705 = vst [vmem:[#allocation7 + $0x158] sm:$0xf] %v851_v5  ;;  %v853_v16 = vpack.c.bf16 %v321_v7, %v321_v7  ;;  %v324_v18 = vmul.f32 %v228_v14, %v132_v13  ;;  %v229_v21 = vld [vmem:[#allocation5 + $0x2e8] sm:$0xff]  ;;  %v230_v22 = vld [vmem:[#allocation5 + $0x2f0] sm:$0xff]  ;;  %v135_v24 = vld [vmem:[#allocation2 + $0x2f8] sm:$0xff] }
  0x66   :  { %v325_v23 = vmul.f32 %v229_v21, %v133_v19  ;;  %v231_v25 = vld [vmem:[#allocation5 + $0x2f8] sm:$0xff]  ;;  %706 = vst [vmem:[#allocation7 + $0x15c] sm:$0xff] %v852_v15  ;;  %v854_v26 = vpack.c.bf16 %v323_v17, %v322_v12  ;;  %v326_v28 = vmul.f32 %v230_v22, %v134_v20 }
  0x67   :  { %707 = vst [vmem:[#allocation7 + $0x164] sm:$0xf] %v853_v16  ;;  %v855_v27 = vpack.c.bf16 %v324_v18, %v324_v18  ;;  %v327_v29 = vmul.f32 %v231_v25, %v135_v24 }
  0x68   :  { %708 = vst [vmem:[#allocation7 + $0x168] sm:$0xff] %v854_v26  ;;  %v856_v30 = vpack.c.bf16 %v326_v28, %v325_v23 }
  0x69   :  { %709 = vst [vmem:[#allocation7 + $0x170] sm:$0xf] %v855_v27  ;;  %v857_v31 = vpack.c.bf16 %v327_v29, %v327_v29 }
  0x6a   :  { %710 = vst [vmem:[#allocation7 + $0x174] sm:$0xff] %v856_v30 }
  0x6b   :  { %711 = vst [vmem:[#allocation7 + $0x17c] sm:$0xf] %v857_v31 }
  0x6c   :  { %920 = shalt.err (!%p917_p6)
}
  0x6d   :  { %s921_s10 = scalar_lea.hbm %s997_s2, 6144 }
  0x6e   :  { %p922_p7 = scmp.ne.s32.totalorder %s997_s2, %s921_s10  ;;  %p925_p8 = scmp.lt.u32.totalorder %s921_s10, %s997_s2 }
  0x70   :  { %p927_p9 = pnand %p925_p8, %p922_p7 }
  0x72   :  { %930 = shalt.err (!%p927_p9)
}
  0x73   :  { %s942_s15 = smov 192   ;;  %s943_s16 = smov 12  }
  0x74   :  { %723 = dma.vmem_to_hbm [thread:$0]  %s718_s6, 6144, %s997_s2, [#allocation4], %s942_s15, %s942_s15, %s943_s16  }
  0x75   :  { %935 = dma.done.wait [#allocation4], 6144  }
  0x76   :  { %936 = vsyncadd [#allocation4], 4294961152 }
  0x77   :  { %727 = vsyncpa [#allocation3], 1 }
  0x78   :  { %728 = vsyncpa [#allocation6], 1 }
  0x79   :  { %729 = vsyncpa [#allocation4], 1 }

</bundles_post_ra>
